<compile_context>
chip_gen: v7x
topology: tpu7x:2x2x1
jax: 0.10.0
libtpu: 0.0.40
codegen_flags: <defaults>
</compile_context>

<pallas_src>
import jax
import jax.numpy as jnp
import numpy as np
from jax.experimental import pallas as pl
from jax.experimental.pallas import tpu as pltpu

SIZES = [2, 10, 1]
_LANE = 128
_SUB = 8
_KP = 8          # padded lane width for the tiny (2-wide) input features
_PRM_ROWS = 16   # packed parameter tile rows (multiple of the sublane count)

# Row layout of the packed (16, 128) parameter tile.
_R_IDEC1, _R_VDEC1, _R_TH1 = 0, 1, 2      # layer-1 LIF params (lanes :10)
_R_W1 = 3                                 # rows 3,4: w1[k, :] for k = 0, 1
_R_W2 = 5                                 # layer-2 weight column over layer-1 lanes
_R_IDEC2, _R_VDEC2, _R_TH2 = 6, 7, 8      # layer-2 LIF params (lane :1)
_R_MASK2 = 9                              # one-hot mask of real layer-2 lanes


def _round_up(n, m):
    return ((n + m - 1) // m) * m


# ---------------------------------------------------------------------------
# Fused rollout kernel: per grid step t, run layer-1 (VPU synapse + LIF) and
# layer-2 (lane reduce + LIF).  LIF state stays resident in VMEM scratch.
# ---------------------------------------------------------------------------
def _spiking_mlp_kernel(x_ref, prm_ref, s0_ref, z_ref, sf_ref, st_ref):
    t = pl.program_id(0)

    # Load the incoming LIF state into the resident scratch on the first step.
    @pl.when(t == 0)
    def _():
        st_ref[...] = s0_ref[...]

    x = x_ref[0]                                           # (Bp, _KP)

    # ---- Layer 1: synapse (K = 2 -> plain VPU mul/add, no MXU) + LIF ----
    syn1 = x[:, 0:1] * prm_ref[_R_W1:_R_W1 + 1, :]
    for k in range(1, SIZES[0]):                           # static unroll (K = 2)
        syn1 = syn1 + x[:, k:k + 1] * prm_ref[_R_W1 + k:_R_W1 + k + 1, :]
    z1s = st_ref[0]
    v1s = st_ref[1]
    i1s = st_ref[2]
    i1 = i1s * prm_ref[_R_IDEC1:_R_IDEC1 + 1, :] + syn1
    v1 = v1s * prm_ref[_R_VDEC1:_R_VDEC1 + 1, :] * (1.0 - z1s) + i1
    # Strict '>' keeps zero-padded lanes (thresh == 0, v == 0) at exactly 0.
    z1 = (v1 - prm_ref[_R_TH1:_R_TH1 + 1, :] > 0.0).astype(jnp.float32)
    st_ref[0] = z1
    st_ref[1] = v1
    st_ref[2] = i1

    # ---- Layer 2 (single real output neuron): lane reduction + LIF ----
    acc = jnp.sum(z1 * prm_ref[_R_W2:_R_W2 + 1, :], axis=-1, keepdims=True)  # (Bp, 1)
    syn2 = acc * prm_ref[_R_MASK2:_R_MASK2 + 1, :]         # precomputed lane-0 mask
    z2s = st_ref[3]
    v2s = st_ref[4]
    i2s = st_ref[5]
    i2 = i2s * prm_ref[_R_IDEC2:_R_IDEC2 + 1, :] + syn2
    v2 = v2s * prm_ref[_R_VDEC2:_R_VDEC2 + 1, :] * (1.0 - z2s) + i2
    z2 = (v2 - prm_ref[_R_TH2:_R_TH2 + 1, :] > 0.0).astype(jnp.float32)
    st_ref[3] = z2
    st_ref[4] = v2
    st_ref[5] = i2

    # Per-step network output (lane-dense (Bp, 128) row; sliced to (B, 1) once
    # outside the rollout).
    z_ref[0] = z2

    # Write the carried state back out once, at the last step.
    @pl.when(t == pl.num_programs(0) - 1)
    def _():
        sf_ref[...] = st_ref[...]


# ---------------------------------------------------------------------------
# Parameter / state handling (all static padding hoisted out of the rollout).
# ---------------------------------------------------------------------------
def init_params(sizes, key):
    """Deterministic synthetic init mirroring the PyTorch module's shapes."""
    layers = []
    for i, size in enumerate(sizes[:-1]):
        out = sizes[i + 1]
        key, kw, ki, kv, kt = jax.random.split(key, 5)
        bound = 1.0 / np.sqrt(size)
        w = jax.random.uniform(kw, (size, out), jnp.float32, -bound, bound)  # (in, out)
        i_decay = jax.random.uniform(ki, (out,), jnp.float32)   # ~ torch.rand(size)
        v_decay = jax.random.uniform(kv, (out,), jnp.float32)
        thresh = jax.random.uniform(kt, (out,), jnp.float32)
        layers.append((w, i_decay, v_decay, thresh))
    return layers


def pack_params(layers):
    """One-time packing of ALL static params into a single (16, 128) f32 tile."""
    assert len(layers) == 2 and SIZES[0] == 2
    (w1, id1, vd1, th1), (w2, id2, vd2, th2) = layers
    fin, f1 = w1.shape
    f2 = w2.shape[1]
    assert fin == SIZES[0] and f1 == SIZES[1] and f2 == SIZES[2]
    prm = jnp.zeros((_PRM_ROWS, _LANE), jnp.float32)
    prm = prm.at[_R_IDEC1, :f1].set(id1)
    prm = prm.at[_R_VDEC1, :f1].set(vd1)
    prm = prm.at[_R_TH1, :f1].set(th1)
    for k in range(fin):
        prm = prm.at[_R_W1 + k, :f1].set(w1[k])
    prm = prm.at[_R_W2, :f1].set(w2[:, 0])
    prm = prm.at[_R_IDEC2, :f2].set(id2)
    prm = prm.at[_R_VDEC2, :f2].set(vd2)
    prm = prm.at[_R_TH2, :f2].set(th2)
    prm = prm.at[_R_MASK2, :f2].set(1.0)
    return prm


def init_state(batch):
    """Zero LIF state == the module's state=None.  Rows 0-2: layer-1 (z, v, i);
    rows 3-5: layer-2 (z, v, i).  Kept in padded (6, Bp, 128) layout between calls."""
    bp = _round_up(batch, _SUB)
    return jnp.zeros((6, bp, _LANE), jnp.float32)


@jax.jit
def spiking_mlp_rollout(x_seq, prm, state):
    """Run T SpikingMLP timesteps in ONE fused pallas_call.

    x_seq : (T, B, 2) inputs, one per timestep.
    prm   : packed (16, 128) parameter tile from pack_params().
    state : packed (6, Bp, 128) LIF state (init_state() or a previous rollout's).
    Returns (z_seq of shape (T, B, 1), new_state of shape (6, Bp, 128)).
    """
    T, B, fin = x_seq.shape
    bp = state.shape[1]
    # Pad the whole input once per rollout (not per step).
    xp = jnp.zeros((T, bp, _KP), jnp.float32).at[:, :B, :fin].set(x_seq)

    grid_spec = pltpu.PrefetchScalarGridSpec(
        num_scalar_prefetch=0,
        grid=(T,),
        in_specs=[
            pl.BlockSpec((1, bp, _KP), lambda t: (t, 0, 0)),       # x[t]
            pl.BlockSpec((_PRM_ROWS, _LANE), lambda t: (0, 0)),    # params (fetched once)
            pl.BlockSpec((6, bp, _LANE), lambda t: (0, 0, 0)),     # initial state (once)
        ],
        out_specs=[
            pl.BlockSpec((1, bp, _LANE), lambda t: (t, 0, 0)),     # z2 per step (lane-dense)
            pl.BlockSpec((6, bp, _LANE), lambda t: (0, 0, 0)),     # final state
        ],
        scratch_shapes=[pltpu.VMEM((6, bp, _LANE), jnp.float32)],  # resident LIF state
    )
    z_pad, new_state = pl.pallas_call(
        _spiking_mlp_kernel,
        out_shape=(jax.ShapeDtypeStruct((T, bp, _LANE), jnp.float32),
                   jax.ShapeDtypeStruct((6, bp, _LANE), jnp.float32)),
        grid_spec=grid_spec,
        compiler_params=pltpu.CompilerParams(
            dimension_semantics=("arbitrary",)),                   # serial time recurrence
    )(xp, prm, state)
    z_seq = z_pad[:, :B, :SIZES[-1]]                               # slice once per rollout
    return z_seq, new_state


# ---------------------------------------------------------------------------
# Pure-JAX reference (mirrors the PyTorch module exactly) for correctness.
# ---------------------------------------------------------------------------
def _reference_step(x, layers, states):
    new_states = []
    z = x
    for (w, idec, vdec, thr), st in zip(layers, states):
        syn = jnp.dot(z, w, precision=jax.lax.Precision.HIGHEST)
        if st is None:
            zs = vs = i_s = jnp.zeros_like(syn)
        else:
            zs, vs, i_s = st
        i = i_s * idec + syn
        v = vs * vdec * (1.0 - zs) + i
        z = (v - thr > 0.0).astype(jnp.float32)
        new_states.append((z, v, i))
    return z, new_states


def _check_state(st_pad, ref_states, batch):
    (z1, v1, i1), (z2, v2, i2) = ref_states
    f1, f2 = SIZES[1], SIZES[2]
    np.testing.assert_allclose(np.asarray(st_pad[0, :batch, :f1]), np.asarray(z1), atol=1e-5)
    np.testing.assert_allclose(np.asarray(st_pad[1, :batch, :f1]), np.asarray(v1), atol=1e-4)
    np.testing.assert_allclose(np.asarray(st_pad[2, :batch, :f1]), np.asarray(i1), atol=1e-4)
    np.testing.assert_allclose(np.asarray(st_pad[3, :batch, :f2]), np.asarray(z2), atol=1e-5)
    np.testing.assert_allclose(np.asarray(st_pad[4, :batch, :f2]), np.asarray(v2), atol=1e-4)
    np.testing.assert_allclose(np.asarray(st_pad[5, :batch, :f2]), np.asarray(i2), atol=1e-4)


if __name__ == "__main__":
    key = jax.random.PRNGKey(0)
    key, kx1, kx2 = jax.random.split(key, 3)
    layers = init_params(SIZES, key)
    prm = pack_params(layers)            # static packing / padding done ONCE

    batch, T = 8, 16
    x_seq1 = jax.random.normal(kx1, (T, batch, SIZES[0]), jnp.float32)
    x_seq2 = jax.random.normal(kx2, (T, batch, SIZES[0]), jnp.float32)

    # --- Rollout 1: starting from zero state (== the module's state=None). ---
    s0 = init_state(batch)
    z_seq1, st1 = spiking_mlp_rollout(x_seq1, prm, s0)
    z_seq1 = jax.block_until_ready(z_seq1)

    ref_states = [None] * len(layers)
    ref_z1 = []
    for t in range(T):
        zt, ref_states = _reference_step(x_seq1[t], layers, ref_states)
        ref_z1.append(zt)
    np.testing.assert_allclose(np.asarray(z_seq1), np.asarray(jnp.stack(ref_z1)), atol=1e-5)
    _check_state(st1, ref_states, batch)

    # --- Rollout 2: carry the padded state from rollout 1 (stateful module). ---
    z_seq2, st2 = spiking_mlp_rollout(x_seq2, prm, st1)
    z_seq2 = jax.block_until_ready(z_seq2)
    ref_z2 = []
    for t in range(T):
        zt, ref_states = _reference_step(x_seq2[t], layers, ref_states)
        ref_z2.append(zt)
    np.testing.assert_allclose(np.asarray(z_seq2), np.asarray(jnp.stack(ref_z2)), atol=1e-5)
    _check_state(st2, ref_states, batch)

    print("KERNEL_OK")
</pallas_src>

<mosaic_0001>
module attributes {stable_mosaic.version = 11 : i64} {
  func.func @_spiking_mlp_kernel(%arg0: i32, %arg1: memref<1x8x8xf32, #tpu.memory_space<vmem>>, %arg2: memref<16x128xf32, #tpu.memory_space<vmem>>, %arg3: memref<6x8x128xf32, #tpu.memory_space<vmem>>, %arg4: memref<1x8x128xf32, #tpu.memory_space<vmem>>, %arg5: memref<6x8x128xf32, #tpu.memory_space<vmem>>, %arg6: memref<6x8x128xf32, #tpu.memory_space<vmem>>) attributes {dimension_semantics = [#tpu.dimension_semantics<arbitrary>], iteration_bounds = array<i64: 16>, scalar_prefetch = 0 : i64, scratch_operands = 1 : i64, tpu.core_type = #tpu.core_type<tc>, window_params = [{transform_indices = @transform_0, window_bounds = array<i64: 1, 8, 8>}, {pipeline_mode = #tpu.pipeline_mode<synchronous>, transform_indices = @transform_1, window_bounds = array<i64: 16, 128>}, {pipeline_mode = #tpu.pipeline_mode<synchronous>, transform_indices = @transform_2, window_bounds = array<i64: 6, 8, 128>}, {transform_indices = @transform_3, window_bounds = array<i64: 1, 8, 128>}, {pipeline_mode = #tpu.pipeline_mode<synchronous>, transform_indices = @transform_4, window_bounds = array<i64: 6, 8, 128>}]} {
    %c0_i32 = arith.constant 0 : i32
    %0 = arith.cmpi eq, %arg0, %c0_i32 : i32
    %1 = arith.extui %0 : i1 to i32
    %c0_i32_0 = arith.constant 0 : i32
    %2 = arith.cmpi ne, %1, %c0_i32_0 : i32
    scf.if %2 {
      %c0_58 = arith.constant 0 : index
      %c0_59 = arith.constant 0 : index
      %c0_60 = arith.constant 0 : index
      %97 = vector.load %arg3[%c0_58, %c0_59, %c0_60] : memref<6x8x128xf32, #tpu.memory_space<vmem>>, vector<6x8x128xf32>
      %c0_61 = arith.constant 0 : index
      %c0_62 = arith.constant 0 : index
      %c0_63 = arith.constant 0 : index
      %98 = vector.load %arg6[%c0_61, %c0_62, %c0_63] : memref<6x8x128xf32, #tpu.memory_space<vmem>>, vector<6x8x128xf32>
      tpu.vector_store %arg6[%c0_61, %c0_62, %c0_63], %97 {strides = array<i32>} : memref<6x8x128xf32, #tpu.memory_space<vmem>>, vector<6x8x128xf32>,
    } else {
    }
    %c0 = arith.constant 0 : index
    %c0_1 = arith.constant 0 : index
    %c0_2 = arith.constant 0 : index
    %3 = vector.load %arg1[%c0, %c0_1, %c0_2] : memref<1x8x8xf32, #tpu.memory_space<vmem>>, vector<1x8x8xf32>
    %4 = vector.shape_cast %3 : vector<1x8x8xf32> to vector<8x8xf32>
    %5 = vector.extract_strided_slice %4 {offsets = [0, 0], sizes = [8, 1], strides = [1, 1]} : vector<8x8xf32> to vector<8x1xf32>
    %c3 = arith.constant 3 : index
    %c0_3 = arith.constant 0 : index
    %6 = vector.load %arg2[%c3, %c0_3] : memref<16x128xf32, #tpu.memory_space<vmem>>, vector<1x128xf32>
    %7 = vector.broadcast %5 : vector<8x1xf32> to vector<8x128xf32>
    %8 = vector.broadcast %6 : vector<1x128xf32> to vector<8x128xf32>
    %9 = arith.mulf %7, %8 : vector<8x128xf32>
    %10 = vector.extract_strided_slice %4 {offsets = [0, 1], sizes = [8, 1], strides = [1, 1]} : vector<8x8xf32> to vector<8x1xf32>
    %c4 = arith.constant 4 : index
    %c0_4 = arith.constant 0 : index
    %11 = vector.load %arg2[%c4, %c0_4] : memref<16x128xf32, #tpu.memory_space<vmem>>, vector<1x128xf32>
    %12 = vector.broadcast %10 : vector<8x1xf32> to vector<8x128xf32>
    %13 = vector.broadcast %11 : vector<1x128xf32> to vector<8x128xf32>
    %14 = arith.mulf %12, %13 : vector<8x128xf32>
    %15 = arith.addf %9, %14 : vector<8x128xf32>
    %c0_5 = arith.constant 0 : index
    %c0_6 = arith.constant 0 : index
    %c0_7 = arith.constant 0 : index
    %16 = vector.load %arg6[%c0_5, %c0_6, %c0_7] : memref<6x8x128xf32, #tpu.memory_space<vmem>>, vector<1x8x128xf32>
    %17 = vector.shape_cast %16 : vector<1x8x128xf32> to vector<8x128xf32>
    %c1 = arith.constant 1 : index
    %c0_8 = arith.constant 0 : index
    %c0_9 = arith.constant 0 : index
    %18 = vector.load %arg6[%c1, %c0_8, %c0_9] : memref<6x8x128xf32, #tpu.memory_space<vmem>>, vector<1x8x128xf32>
    %19 = vector.shape_cast %18 : vector<1x8x128xf32> to vector<8x128xf32>
    %c2 = arith.constant 2 : index
    %c0_10 = arith.constant 0 : index
    %c0_11 = arith.constant 0 : index
    %20 = vector.load %arg6[%c2, %c0_10, %c0_11] : memref<6x8x128xf32, #tpu.memory_space<vmem>>, vector<1x8x128xf32>
    %21 = vector.shape_cast %20 : vector<1x8x128xf32> to vector<8x128xf32>
    %c0_12 = arith.constant 0 : index
    %c0_13 = arith.constant 0 : index
    %22 = vector.load %arg2[%c0_12, %c0_13] : memref<16x128xf32, #tpu.memory_space<vmem>>, vector<1x128xf32>
    %23 = vector.broadcast %22 : vector<1x128xf32> to vector<8x128xf32>
    %24 = arith.mulf %21, %23 : vector<8x128xf32>
    %25 = arith.addf %24, %15 : vector<8x128xf32>
    %c1_14 = arith.constant 1 : index
    %c0_15 = arith.constant 0 : index
    %26 = vector.load %arg2[%c1_14, %c0_15] : memref<16x128xf32, #tpu.memory_space<vmem>>, vector<1x128xf32>
    %27 = vector.broadcast %26 : vector<1x128xf32> to vector<8x128xf32>
    %28 = arith.mulf %19, %27 : vector<8x128xf32>
    %cst = arith.constant 1.000000e+00 : f32
    %29 = vector.broadcast %cst : f32 to vector<8x128xf32>
    %30 = arith.subf %29, %17 : vector<8x128xf32>
    %31 = arith.mulf %28, %30 : vector<8x128xf32>
    %32 = arith.addf %31, %25 : vector<8x128xf32>
    %c2_16 = arith.constant 2 : index
    %c0_17 = arith.constant 0 : index
    %33 = vector.load %arg2[%c2_16, %c0_17] : memref<16x128xf32, #tpu.memory_space<vmem>>, vector<1x128xf32>
    %34 = vector.broadcast %33 : vector<1x128xf32> to vector<8x128xf32>
    %35 = arith.subf %32, %34 : vector<8x128xf32>
    %cst_18 = arith.constant 0.000000e+00 : f32
    %36 = vector.broadcast %cst_18 : f32 to vector<8x128xf32>
    %37 = arith.cmpf ogt, %35, %36 : vector<8x128xf32>
    %38 = arith.extui %37 : vector<8x128xi1> to vector<8x128xi32>
    %39 = arith.sitofp %38 : vector<8x128xi32> to vector<8x128xf32>
    %c0_19 = arith.constant 0 : index
    %c0_20 = arith.constant 0 : index
    %c0_21 = arith.constant 0 : index
    %40 = vector.load %arg6[%c0_19, %c0_20, %c0_21] : memref<6x8x128xf32, #tpu.memory_space<vmem>>, vector<1x8x128xf32>
    %41 = vector.shape_cast %40 : vector<1x8x128xf32> to vector<8x128xf32>
    %42 = vector.shape_cast %39 : vector<8x128xf32> to vector<1x8x128xf32>
    tpu.vector_store %arg6[%c0_19, %c0_20, %c0_21], %42 {strides = array<i32>} : memref<6x8x128xf32, #tpu.memory_space<vmem>>, vector<1x8x128xf32>,
    %c1_22 = arith.constant 1 : index
    %c0_23 = arith.constant 0 : index
    %c0_24 = arith.constant 0 : index
    %43 = vector.load %arg6[%c1_22, %c0_23, %c0_24] : memref<6x8x128xf32, #tpu.memory_space<vmem>>, vector<1x8x128xf32>
    %44 = vector.shape_cast %43 : vector<1x8x128xf32> to vector<8x128xf32>
    %45 = vector.shape_cast %32 : vector<8x128xf32> to vector<1x8x128xf32>
    tpu.vector_store %arg6[%c1_22, %c0_23, %c0_24], %45 {strides = array<i32>} : memref<6x8x128xf32, #tpu.memory_space<vmem>>, vector<1x8x128xf32>,
    %c2_25 = arith.constant 2 : index
    %c0_26 = arith.constant 0 : index
    %c0_27 = arith.constant 0 : index
    %46 = vector.load %arg6[%c2_25, %c0_26, %c0_27] : memref<6x8x128xf32, #tpu.memory_space<vmem>>, vector<1x8x128xf32>
    %47 = vector.shape_cast %46 : vector<1x8x128xf32> to vector<8x128xf32>
    %48 = vector.shape_cast %25 : vector<8x128xf32> to vector<1x8x128xf32>
    tpu.vector_store %arg6[%c2_25, %c0_26, %c0_27], %48 {strides = array<i32>} : memref<6x8x128xf32, #tpu.memory_space<vmem>>, vector<1x8x128xf32>,
    %c5 = arith.constant 5 : index
    %c0_28 = arith.constant 0 : index
    %49 = vector.load %arg2[%c5, %c0_28] : memref<16x128xf32, #tpu.memory_space<vmem>>, vector<1x128xf32>
    %50 = vector.broadcast %49 : vector<1x128xf32> to vector<8x128xf32>
    %51 = arith.mulf %39, %50 : vector<8x128xf32>
    %cst_29 = arith.constant dense<0.000000e+00> : vector<8xf32>
    %52 = vector.multi_reduction <add>, %51, %cst_29 [1] : vector<8x128xf32> to vector<8xf32>
    %53 = vector.shape_cast %52 : vector<8xf32> to vector<8x1xf32>
    %c9 = arith.constant 9 : index
    %c0_30 = arith.constant 0 : index
    %54 = vector.load %arg2[%c9, %c0_30] : memref<16x128xf32, #tpu.memory_space<vmem>>, vector<1x128xf32>
    %55 = vector.broadcast %53 : vector<8x1xf32> to vector<8x128xf32>
    %56 = vector.broadcast %54 : vector<1x128xf32> to vector<8x128xf32>
    %57 = arith.mulf %55, %56 : vector<8x128xf32>
    %c3_31 = arith.constant 3 : index
    %c0_32 = arith.constant 0 : index
    %c0_33 = arith.constant 0 : index
    %58 = vector.load %arg6[%c3_31, %c0_32, %c0_33] : memref<6x8x128xf32, #tpu.memory_space<vmem>>, vector<1x8x128xf32>
    %59 = vector.shape_cast %58 : vector<1x8x128xf32> to vector<8x128xf32>
    %c4_34 = arith.constant 4 : index
    %c0_35 = arith.constant 0 : index
    %c0_36 = arith.constant 0 : index
    %60 = vector.load %arg6[%c4_34, %c0_35, %c0_36] : memref<6x8x128xf32, #tpu.memory_space<vmem>>, vector<1x8x128xf32>
    %61 = vector.shape_cast %60 : vector<1x8x128xf32> to vector<8x128xf32>
    %c5_37 = arith.constant 5 : index
    %c0_38 = arith.constant 0 : index
    %c0_39 = arith.constant 0 : index
    %62 = vector.load %arg6[%c5_37, %c0_38, %c0_39] : memref<6x8x128xf32, #tpu.memory_space<vmem>>, vector<1x8x128xf32>
    %63 = vector.shape_cast %62 : vector<1x8x128xf32> to vector<8x128xf32>
    %c6 = arith.constant 6 : index
    %c0_40 = arith.constant 0 : index
    %64 = vector.load %arg2[%c6, %c0_40] : memref<16x128xf32, #tpu.memory_space<vmem>>, vector<1x128xf32>
    %65 = vector.broadcast %64 : vector<1x128xf32> to vector<8x128xf32>
    %66 = arith.mulf %63, %65 : vector<8x128xf32>
    %67 = arith.addf %66, %57 : vector<8x128xf32>
    %c7 = arith.constant 7 : index
    %c0_41 = arith.constant 0 : index
    %68 = vector.load %arg2[%c7, %c0_41] : memref<16x128xf32, #tpu.memory_space<vmem>>, vector<1x128xf32>
    %69 = vector.broadcast %68 : vector<1x128xf32> to vector<8x128xf32>
    %70 = arith.mulf %61, %69 : vector<8x128xf32>
    %cst_42 = arith.constant 1.000000e+00 : f32
    %71 = vector.broadcast %cst_42 : f32 to vector<8x128xf32>
    %72 = arith.subf %71, %59 : vector<8x128xf32>
    %73 = arith.mulf %70, %72 : vector<8x128xf32>
    %74 = arith.addf %73, %67 : vector<8x128xf32>
    %c8 = arith.constant 8 : index
    %c0_43 = arith.constant 0 : index
    %75 = vector.load %arg2[%c8, %c0_43] : memref<16x128xf32, #tpu.memory_space<vmem>>, vector<1x128xf32>
    %76 = vector.broadcast %75 : vector<1x128xf32> to vector<8x128xf32>
    %77 = arith.subf %74, %76 : vector<8x128xf32>
    %cst_44 = arith.constant 0.000000e+00 : f32
    %78 = vector.broadcast %cst_44 : f32 to vector<8x128xf32>
    %79 = arith.cmpf ogt, %77, %78 : vector<8x128xf32>
    %80 = arith.extui %79 : vector<8x128xi1> to vector<8x128xi32>
    %81 = arith.sitofp %80 : vector<8x128xi32> to vector<8x128xf32>
    %c3_45 = arith.constant 3 : index
    %c0_46 = arith.constant 0 : index
    %c0_47 = arith.constant 0 : index
    %82 = vector.load %arg6[%c3_45, %c0_46, %c0_47] : memref<6x8x128xf32, #tpu.memory_space<vmem>>, vector<1x8x128xf32>
    %83 = vector.shape_cast %82 : vector<1x8x128xf32> to vector<8x128xf32>
    %84 = vector.shape_cast %81 : vector<8x128xf32> to vector<1x8x128xf32>
    tpu.vector_store %arg6[%c3_45, %c0_46, %c0_47], %84 {strides = array<i32>} : memref<6x8x128xf32, #tpu.memory_space<vmem>>, vector<1x8x128xf32>,
    %c4_48 = arith.constant 4 : index
    %c0_49 = arith.constant 0 : index
    %c0_50 = arith.constant 0 : index
    %85 = vector.load %arg6[%c4_48, %c0_49, %c0_50] : memref<6x8x128xf32, #tpu.memory_space<vmem>>, vector<1x8x128xf32>
    %86 = vector.shape_cast %85 : vector<1x8x128xf32> to vector<8x128xf32>
    %87 = vector.shape_cast %74 : vector<8x128xf32> to vector<1x8x128xf32>
    tpu.vector_store %arg6[%c4_48, %c0_49, %c0_50], %87 {strides = array<i32>} : memref<6x8x128xf32, #tpu.memory_space<vmem>>, vector<1x8x128xf32>,
    %c5_51 = arith.constant 5 : index
    %c0_52 = arith.constant 0 : index
    %c0_53 = arith.constant 0 : index
    %88 = vector.load %arg6[%c5_51, %c0_52, %c0_53] : memref<6x8x128xf32, #tpu.memory_space<vmem>>, vector<1x8x128xf32>
    %89 = vector.shape_cast %88 : vector<1x8x128xf32> to vector<8x128xf32>
    %90 = vector.shape_cast %67 : vector<8x128xf32> to vector<1x8x128xf32>
    tpu.vector_store %arg6[%c5_51, %c0_52, %c0_53], %90 {strides = array<i32>} : memref<6x8x128xf32, #tpu.memory_space<vmem>>, vector<1x8x128xf32>,
    %c0_54 = arith.constant 0 : index
    %c0_55 = arith.constant 0 : index
    %c0_56 = arith.constant 0 : index
    %91 = vector.load %arg4[%c0_54, %c0_55, %c0_56] : memref<1x8x128xf32, #tpu.memory_space<vmem>>, vector<1x8x128xf32>
    %92 = vector.shape_cast %91 : vector<1x8x128xf32> to vector<8x128xf32>
    %93 = vector.shape_cast %81 : vector<8x128xf32> to vector<1x8x128xf32>
    tpu.vector_store %arg4[%c0_54, %c0_55, %c0_56], %93 {strides = array<i32>} : memref<1x8x128xf32, #tpu.memory_space<vmem>>, vector<1x8x128xf32>,
    %c15_i32 = arith.constant 15 : i32
    %94 = arith.cmpi eq, %arg0, %c15_i32 : i32
    %95 = arith.extui %94 : i1 to i32
    %c0_i32_57 = arith.constant 0 : i32
    %96 = arith.cmpi ne, %95, %c0_i32_57 : i32
    scf.if %96 {
      %c0_58 = arith.constant 0 : index
      %c0_59 = arith.constant 0 : index
      %c0_60 = arith.constant 0 : index
      %97 = vector.load %arg6[%c0_58, %c0_59, %c0_60] : memref<6x8x128xf32, #tpu.memory_space<vmem>>, vector<6x8x128xf32>
      %c0_61 = arith.constant 0 : index
      %c0_62 = arith.constant 0 : index
      %c0_63 = arith.constant 0 : index
      %98 = vector.load %arg5[%c0_61, %c0_62, %c0_63] : memref<6x8x128xf32, #tpu.memory_space<vmem>>, vector<6x8x128xf32>
      tpu.vector_store %arg5[%c0_61, %c0_62, %c0_63], %97 {strides = array<i32>} : memref<6x8x128xf32, #tpu.memory_space<vmem>>, vector<6x8x128xf32>,
    } else {
    }
    return
  }
  func.func @transform_0(%arg0: i32) -> (i32, i32, i32) {
    %c0_i32 = arith.constant 0 : i32
    %c0_i32_0 = arith.constant 0 : i32
    %c0_i32_1 = arith.constant 0 : i32
    return %arg0, %c0_i32, %c0_i32_0 : i32, i32, i32
  }
  func.func @transform_1(%arg0: i32) -> (i32, i32) {
    %c0_i32 = arith.constant 0 : i32
    %c0_i32_0 = arith.constant 0 : i32
    %c0_i32_1 = arith.constant 0 : i32
    return %c0_i32, %c0_i32_0 : i32, i32
  }
  func.func @transform_2(%arg0: i32) -> (i32, i32, i32) {
    %c0_i32 = arith.constant 0 : i32
    %c0_i32_0 = arith.constant 0 : i32
    %c0_i32_1 = arith.constant 0 : i32
    %c0_i32_2 = arith.constant 0 : i32
    return %c0_i32, %c0_i32_0, %c0_i32_1 : i32, i32, i32
  }
  func.func @transform_3(%arg0: i32) -> (i32, i32, i32) {
    %c0_i32 = arith.constant 0 : i32
    %c0_i32_0 = arith.constant 0 : i32
    %c0_i32_1 = arith.constant 0 : i32
    return %arg0, %c0_i32, %c0_i32_0 : i32, i32, i32
  }
  func.func @transform_4(%arg0: i32) -> (i32, i32, i32) {
    %c0_i32 = arith.constant 0 : i32
    %c0_i32_0 = arith.constant 0 : i32
    %c0_i32_1 = arith.constant 0 : i32
    %c0_i32_2 = arith.constant 0 : i32
    return %c0_i32, %c0_i32_0, %c0_i32_1 : i32, i32, i32
  }
}

</mosaic_0001>

<bundles_post_ra>
// kernel: spiking_mlp_rollout.1
= control target key start
LH: loop header
LB: loop body
LE: loop exit
PB: predicated region body
PF: predicated region fallthrough
CT: control target
= control target key end

     0   :  { %10 = vsyncpa [#allocation4], 0  ;;  %s524_s15 = smov 0   ;;  %s621_s0 = inlined_call_operand.vmem [shape: f32[16,8,8], index: 0, kind: input, shape index: {}]   ;;  %s622_s1 = inlined_call_operand.vmem [shape: f32[16,128], index: 1, kind: input, shape index: {}]   ;;  %s623_s2 = inlined_call_operand.vmem [shape: f32[6,8,128], index: 2, kind: input, shape index: {}]   ;;  %s624_s3 = inlined_call_operand.vmem [shape: f32[16,8,128], index: 3, kind: output, shape index: {0}]   ;;  %s625_s4 = inlined_call_operand.hbm [shape: f32[6,8,128], index: 4, kind: output, shape index: {1}]  }
   0x1 LB: > { %s530_s16 = sadd.s32 4294967295, %s491_s15   ;;  %p412_p0 = scmp.ge.s32.totalorder %s491_s15, 1  ;;  %s491_s15 = sphi %s524_s15, %s16_s15  }
   0x2   : > { %p160_p1 = scmp.lt.s32.totalorder %s491_s15, 17 }
   0x4   : > { %p161_p2 = pnand %p412_p0, %p160_p1 }
   0x5   : > { %p184_p3 = scmp.lt.s32.totalorder (!%p161_p2), %s530_s16, 15  ;;  %p415_p4 = scmp.ne.s32.totalorder (!%p161_p2), %s530_s16, 0 }
   0x6   : > { %164 = sbr.rel (%p161_p2) target bundleno = 357 (0x165), region = 32 }
   0xd   : > { %s185_s17 = scalar_select %p184_p3, %s530_s16, 15 }
   0xe   : > { %195 = sbr.rel (%p415_p4) target bundleno = 21 (0x15), region = 36  ;;  %v196_v0 = vld [vmem:[%s623_s2] sm:$0xff] (!%p415_p4)  ;;  %v197_v1 = vld [vmem:[%s623_s2 + $0x8] sm:$0xff] (!%p415_p4)  ;;  %v198_v2 = vld [vmem:[%s623_s2 + $0x10] sm:$0xff] (!%p415_p4) }
   0xf   : > { %s413_s18 = sshll.u32 %s185_s17, 3  ;;  %202 = vst [vmem:[#allocation2] sm:$0xff] (!%p415_p4), %v196_v0  ;;  %203 = vst [vmem:[#allocation2 + $0x8] sm:$0xff] (!%p415_p4), %v197_v1  ;;  %v199_v3 = vld [vmem:[%s623_s2 + $0x18] sm:$0xff] (!%p415_p4)  ;;  %v200_v4 = vld [vmem:[%s623_s2 + $0x20] sm:$0xff] (!%p415_p4) }
  0x10   : > { %s187_s21 = scalar_lea.vmem %s621_s0, %s413_s18  ;;  %s542_s24 = scalar_lea.vmem %s624_s3, %s413_s18  ;;  %204 = vst [vmem:[#allocation2 + $0x10] sm:$0xff] (!%p415_p4), %v198_v2  ;;  %v201_v5 = vld [vmem:[%s623_s2 + $0x28] sm:$0xff] (!%p415_p4)  ;;  %205 = vst [vmem:[#allocation2 + $0x18] sm:$0xff] (!%p415_p4), %v199_v3 }
  0x11   : > { %206 = vst [vmem:[#allocation2 + $0x20] sm:$0xff] (!%p415_p4), %v200_v4  ;;  %207 = vst [vmem:[#allocation2 + $0x28] sm:$0xff] (!%p415_p4), %v201_v5 }
  0x15 PF: > { %v208_v6 = vld [vmem:[%s187_s21] sm:$0xff]  ;;  %v493_v7 = vmov 0   ;;  %v494_v8 = vmov 1   ;;  %v495_v30 = vmov 0.0   ;;  %v423_v40 = vld [vmem:[%s622_s1 + $0x9] ss:$0 sm:$0xff] }
  0x16   : > { %453 = vset.pattern.permute.xlu0 %v493_v7  ;;  %v231_v10 = vld [vmem:[#allocation2] sm:$0xff]  ;;  %v233_v11 = vld [vmem:[#allocation2 + $0x8] sm:$0xff]  ;;  %p428_p5 = scmp.ne.s32.totalorder %s530_s16, 15 }
  0x17   : > { %212 = vperm.xlu0 %453, %v208_v6   ;;  %v419_v12 = vld [vmem:[%s622_s1 + $0x1] ss:$0 sm:$0xff]  ;;  %v416_v13 = vld [vmem:[%s622_s1 + $0x3] ss:$0 sm:$0xff]  ;;  %v417_v14 = vld [vmem:[%s622_s1 + $0x4] ss:$0 sm:$0xff] }
  0x18   : > { %v235_v15 = vld [vmem:[#allocation2 + $0x10] sm:$0xff]  ;;  %v418_v16 = vld [vmem:[%s622_s1] ss:$0 sm:$0xff]  ;;  %v248_v17 = vmul.f32 %v419_v12, %v233_v11  ;;  %v249_v18 = vsub.f32 1.0, %v231_v10  ;;  %v420_v26 = vld [vmem:[%s622_s1 + $0x2] ss:$0 sm:$0xff] }
  0x19   : > { %v241_v21 = vmul.f32 %v418_v16, %v235_v15  ;;  %v422_v29 = vld [vmem:[%s622_s1 + $0x5] ss:$0 sm:$0xff]  ;;  %v279_v33 = vld [vmem:[#allocation2 + $0x18] sm:$0xff]  ;;  %v425_v35 = vld [vmem:[%s622_s1 + $0x7] ss:$0 sm:$0xff] }
  0x1a   : > { %v250_v24 = vmul.f32 %v249_v18, %v248_v17  ;;  %v281_v34 = vld [vmem:[#allocation2 + $0x20] sm:$0xff]  ;;  %v283_v36 = vld [vmem:[#allocation2 + $0x28] sm:$0xff]  ;;  %v297_v39 = vsub.f32 1.0, %v279_v33 }
  0x1b   : > { %454 = vset.pattern.permute.xlu0 %v494_v8  ;;  %v424_v37 = vld [vmem:[%s622_s1 + $0x6] ss:$0 sm:$0xff]  ;;  %v296_v38 = vmul.f32 %v425_v35, %v281_v34  ;;  %v426_v46 = vld [vmem:[%s622_s1 + $0x8] ss:$0 sm:$0xff] }
  0x1c   : > { %222 = vperm.xlu0 %454, %v208_v6   ;;  %v289_v41 = vmul.f32 %v424_v37, %v283_v36 }
  0x1d   : > { %v298_v43 = vmul.f32 %v297_v39, %v296_v38 }
  0x96   : > { %v213_v9 = vpop.permute.xlu0 %212 }
  0x97   : > { %v219_v20 = vmul.f32 %v416_v13, %v213_v9 }
  0x9b   : > { %v223_v19 = vpop.permute.xlu0 %222 }
  0x9c   : > { %v229_v22 = vmul.f32 %v417_v14, %v223_v19 }
  0x9e   : > { %v230_v23 = vadd.f32 %v229_v22, %v219_v20 }
  0xa0   : > { %v242_v25 = vadd.f32 %v241_v21, %v230_v23 }
  0xa2   : > { %263 = vst [vmem:[#allocation2 + $0x10] sm:$0xff] %v242_v25  ;;  %v251_v27 = vadd.f32 %v250_v24, %v242_v25 }
  0xa4   : > { %v257_v28 = vsub.f32 %v251_v27, %v420_v26  ;;  %262 = vst [vmem:[#allocation2 + $0x8] sm:$0xff] %v251_v27 }
  0xa6   : > { %vm258_vm0 = vcmp.gt.f32.partialorder %v257_v28, 0.0 }
  0xa7   : > { %v421_v31 = vsel %vm258_vm0, 1.0, %v495_v30 }
  0xa8   : > { %v269_v32 = vmul.f32 %v422_v29, %v421_v31  ;;  %261 = vst [vmem:[#allocation2] sm:$0xff] %v421_v31 }
  0xa9   : > { %v319_v52 = vld [vmem:[#allocation2 + $0x10] sm:$0xff] (!%p428_p5) }
  0xaa   : > { %270 = vadd.xlane.f32.xlu1 %v269_v32  ;;  %325 = vst [vmem:[#allocation3 + $0x10] sm:$0xff] (!%p428_p5), %v319_v52 }
  0xab   : > { %v318_v51 = vld [vmem:[#allocation2 + $0x8] sm:$0xff] (!%p428_p5) }
  0xac   : > { %324 = vst [vmem:[#allocation3 + $0x8] sm:$0xff] (!%p428_p5), %v318_v51 }
  0xaf   : > { %v317_v50 = vld [vmem:[#allocation2] sm:$0xff] (!%p428_p5) }
  0xb0   : > { %323 = vst [vmem:[#allocation3] sm:$0xff] (!%p428_p5), %v317_v50 }
 0x137   : > { %v271_v42 = vpop.xlane.xlu1 %270 }
 0x138   : > { %v277_v44 = vmul.f32 %v423_v40, %v271_v42 }
 0x13a   : > { %v290_v45 = vadd.f32 %v289_v41, %v277_v44 }
 0x13c   : > { %v299_v47 = vadd.f32 %v298_v43, %v290_v45  ;;  %311 = vst [vmem:[#allocation2 + $0x28] sm:$0xff] %v290_v45  ;;  %316 = sbr.rel (%p428_p5) target bundleno = 331 (0x14b), region = 40 }
 0x13e   : > { %v305_v48 = vsub.f32 %v299_v47, %v426_v46  ;;  %310 = vst [vmem:[#allocation2 + $0x20] sm:$0xff] %v299_v47 }
 0x140   : > { %vm306_vm1 = vcmp.gt.f32.partialorder %v305_v48, 0.0 }
 0x141   : > { %v427_v49 = vsel %vm306_vm1, 1.0, %v495_v30 }
 0x142   : > { %309 = vst [vmem:[#allocation2 + $0x18] sm:$0xff] %v427_v49  ;;  %312 = vst [vmem:[%s542_s24] sm:$0xff] %v427_v49 }
 0x143   : > { %v322_v55 = vld [vmem:[#allocation2 + $0x28] sm:$0xff] }
 0x144   : > { %328 = vst [vmem:[#allocation3 + $0x28] sm:$0xff] %v322_v55 }
 0x145   : > { %v321_v54 = vld [vmem:[#allocation2 + $0x20] sm:$0xff] }
 0x146   : > { %327 = vst [vmem:[#allocation3 + $0x20] sm:$0xff] %v321_v54 }
 0x149   : > { %v320_v53 = vld [vmem:[#allocation2 + $0x18] sm:$0xff] }
 0x14a   : > { %326 = vst [vmem:[#allocation3 + $0x18] sm:$0xff] %v320_v53 }
 0x14b PF: > { %p437_p6 = scmp.eq.s32.totalorder %s530_s16, 15  ;;  %s496_s24 = smov [#allocation3]  }
 0x14c   : > { %s342_s8 = sshll.u32 %s496_s24, 4  ;;  %s343_s8 = int_to_ptr.vmem [resolvable:$true] %s342_s8 }
 0x14d   : > { %s455_s9 = scalar_lea.vmem %s343_s8, 768  ;;  %p462_p10 = scmp.lt.s32.totalorder %s343_s8, %s343_s8 }
 0x14e   : > { %p456_p7 = scmp.ne.s32.totalorder %s343_s8, %s455_s9  ;;  %p463_p11 = scmp.lt.s32.totalorder %s455_s9, %s455_s9 }
 0x150   : > { %p457_p8 = pnand %p456_p7, %p437_p6  ;;  %p464_p12 = por %p463_p11, %p462_p10 }
 0x152   : > { %p458_p9 = pneg %p457_p8 }
 0x154   : > { %p465_p13 = pnand %p464_p12, %p458_p9 }
 0x156   : > { %468 = shalt.err (!%p465_p13)
}
 0x157   : > { %s469_s12 = scalar_lea.hbm %s625_s4, 768 }
 0x158   : > { %p470_p0 = scmp.ne.s32.totalorder %s625_s4, %s469_s12  ;;  %p475_p3 = scmp.lt.u32.totalorder %s469_s12, %s625_s4 }
 0x15a   : > { %p471_p1 = pnand %p470_p0, %p437_p6 }
 0x15c   : > { %p472_p2 = pneg %p471_p1 }
 0x15e   : > { %p477_p4 = pnand %p475_p3, %p472_p2 }
 0x160   : > { %480 = shalt.err (!%p477_p4)
}
 0x161   : > { %s497_s19 = smov 128   ;;  %s498_s20 = smov 8  }
 0x162   : > { %434 = dma.vmem_to_hbm [thread:$0]  (%p437_p6), %s343_s8, 768, %s625_s4, [#allocation4], %s497_s19, %s497_s19, %s498_s20  }
 0x163   : > { %486 = dma.done.wait (%p437_p6), [#allocation4], 768  }
 0x164   : > { %488 = vsyncadd (%p437_p6), [#allocation4], 4294966528 }
 0x165 PF: > { %s16_s15 = sadd.s32 1, %s491_s15  }
 0x166   : > { %p13_p5 = scmp.ge.s32.totalorder %s16_s15, 18  }
 0x168   :  { %15 = sbr.rel (!%p13_p5) target bundleno = 1 (0x1), region = 84 }
 0x16f   :  { %365 = vsyncpa [#allocation4], 1 }
 0x170   :  { %367 = vsyncpa [#allocation4 + $0x1], 1 }

</bundles_post_ra>
